<compile_context>
chip_gen: v7x
topology: tpu7x:2x2x1
jax: 0.10.0
libtpu: 0.0.40
codegen_flags: <defaults>
</compile_context>

<pallas_src>
import functools

import jax
import jax.numpy as jnp
from jax.experimental import pallas as pl
from jax.experimental.pallas import tpu as pltpu

# Original layer dimensions (encoder then decoder).
DIMS = [784, 128, 64, 12, 3, 12, 64, 128, 784]
# ReLU applied after every original layer except encoder_lin4 (idx 3) and decoder_lin4 (idx 7).
RELU_AFTER = {0, 1, 2, 4, 5, 6}

# After fusing original layers 3 (12->3) and 4 (3->12) — no ReLU between them —
# the kernel runs 7 layers; ReLU follows every fused layer except the last.
FUSED_RELU_AFTER = (True, True, True, True, True, True, False)
N_FUSED = len(FUSED_RELU_AFTER)


def _cdiv(a, b):
    return -(-a // b)


def _round_up(x, m):
    return _cdiv(x, m) * m


def _ae_kernel(x_ref, *refs):
    """Full fused autoencoder forward for one batch tile, entirely in VMEM.

    refs = (w0, b0, w1, b1, ..., w6, b6, out_ref)
    Weights are bf16 (in, out); biases are f32 (1, out); accumulation is f32.
    """
    out_ref = refs[-1]
    params = refs[:-1]
    # Input tile arrives as f32 straight from HBM (single pass over x);
    # cast to bf16 in VMEM for the MXU.
    h = x_ref[...].astype(jnp.bfloat16)          # (block_b, 784)
    for i, apply_relu in enumerate(FUSED_RELU_AFTER):
        w = params[2 * i][...]                   # (in, out) bf16
        b = params[2 * i + 1][...]               # (1, out)  f32
        acc = jnp.dot(h, w, preferred_element_type=jnp.float32) + b
        if apply_relu:
            acc = jnp.maximum(acc, 0.0)
        # f32 bias-add/ReLU (v5e VPU has no bf16 ALU), bf16 only for the MXU.
        h = acc if i == N_FUSED - 1 else acc.astype(jnp.bfloat16)
    out_ref[...] = h.astype(out_ref.dtype)


def _choose_tiling(B, block_b):
    """Pick a sublane-aligned batch tile so that (a) padding waste is at most a
    few rows, and (b) there are >= 2 grid steps when B is large enough, so both
    TensorCores get work on v7x megacore."""
    n_tiles = max(_cdiv(B, block_b), 1)
    if B >= 16:
        n_tiles = max(n_tiles, 2)
    eff_block = _round_up(_cdiv(B, n_tiles), 8)
    n_tiles = _cdiv(B, eff_block)
    return eff_block, n_tiles


@functools.partial(jax.jit, static_argnames=("block_b",))
def linear_ae_forward(x, params, *, block_b=512):
    """Run the LinearAE forward pass as a single Pallas kernel.

    x:      (B, 784) float32
    params: list of 8 (w_i, b_i) pairs with w_i (in, out), b_i (out,)
            (w_pallas = w_torch.T, so the kernel computes x @ W + b)
    Returns (B, 784) float32.
    """
    B, F = x.shape
    assert F == DIMS[0]
    params = list(params)

    # ---- parameter prep (traced once under jit) -----------------------------
    # Exact fusion of encoder_lin4 (12->3) and decoder_lin1 (3->12): no ReLU
    # between them, so (h@W3+b3)@W4+b4 == h@(W3@W4) + (b3@W4 + b4).
    w3, b3 = params[3]
    w4, b4 = params[4]
    fused = params[:3] + [(w3 @ w4, b3 @ w4 + b4)] + params[5:]

    # ---- batch tiling (no wrapper padding; Pallas masks the ragged tail) ----
    eff_block, n_tiles = _choose_tiling(B, block_b)

    in_specs = [pl.BlockSpec((eff_block, F), lambda i: (i, 0))]
    flat_params = []
    for (w, b) in fused:
        in_f, out_f = w.shape
        flat_params.append(w.astype(jnp.bfloat16))
        flat_params.append(b.reshape(1, out_f).astype(jnp.float32))
        # Weights/biases are tiny (<0.5 MiB bf16 total); constant block index
        # keeps them VMEM-resident across all grid steps (no re-DMA).
        in_specs.append(pl.BlockSpec((in_f, out_f), lambda i: (0, 0)))
        in_specs.append(pl.BlockSpec((1, out_f), lambda i: (0, 0)))

    out_spec = pl.BlockSpec((eff_block, F), lambda i: (i, 0))

    out = pl.pallas_call(
        _ae_kernel,
        out_shape=jax.ShapeDtypeStruct((B, F), x.dtype),
        grid_spec=pltpu.PrefetchScalarGridSpec(
            num_scalar_prefetch=0,
            grid=(n_tiles,),
            in_specs=in_specs,
            out_specs=out_spec,
        ),
        compiler_params=pltpu.CompilerParams(
            dimension_semantics=("parallel",),
            # ~12 MiB actually used at block 512; 32 MiB leaves headroom and
            # stays well inside v7x's 64 MiB physical VMEM per TensorCore.
            vmem_limit_bytes=32 * 1024 * 1024,
        ),
    )(x, *flat_params)

    return out


def init_params(key):
    """Deterministic synthetic parameters (PyTorch-like uniform(-1/sqrt(in), 1/sqrt(in)))."""
    params = []
    for i in range(len(DIMS) - 1):
        in_f, out_f = DIMS[i], DIMS[i + 1]
        key, kw, kb = jax.random.split(key, 3)
        bound = 1.0 / jnp.sqrt(jnp.float32(in_f))
        w = jax.random.uniform(kw, (in_f, out_f), jnp.float32, -bound, bound)
        b = jax.random.uniform(kb, (out_f,), jnp.float32, -bound, bound)
        params.append((w, b))
    return params


def reference_forward(x, params):
    """Plain-JAX f32 reference identical to the PyTorch forward (no fusion, no bf16)."""
    h = x
    for i, (w, b) in enumerate(params):
        h = h @ w + b
        if i in RELU_AFTER:
            h = jnp.maximum(h, 0.0)
    return h


if __name__ == "__main__":
    key = jax.random.PRNGKey(0)
    key, kx1, kx2 = jax.random.split(key, 3)
    params = init_params(key)

    # Small ragged batch: single grid step, tile padded to 8 rows by Pallas.
    x_small = jax.random.normal(kx1, (4, 784), dtype=jnp.float32)
    out_small = jax.block_until_ready(linear_ae_forward(x_small, params))
    ref_small = reference_forward(x_small, params)
    assert out_small.shape == (4, 784), out_small.shape
    # bf16 MXU operands with f32 accumulation: loosened tolerance vs f32 reference.
    assert jnp.allclose(out_small, ref_small, atol=5e-2, rtol=5e-2), "mismatch (B=4)"

    # Medium ragged batch: exercises the 2-tile ("parallel") path with a masked tail.
    x_med = jax.random.normal(kx2, (40, 784), dtype=jnp.float32)
    out_med = jax.block_until_ready(linear_ae_forward(x_med, params))
    ref_med = reference_forward(x_med, params)
    assert out_med.shape == (40, 784), out_med.shape
    assert jnp.allclose(out_med, ref_med, atol=5e-2, rtol=5e-2), "mismatch (B=40)"

    print("KERNEL_OK")
</pallas_src>

<mosaic_0001>
module attributes {stable_mosaic.version = 11 : i64} {
  func.func @_ae_kernel(%arg0: i32, %arg1: memref<8x784xf32, #tpu.memory_space<vmem>>, %arg2: memref<784x128xbf16, #tpu.memory_space<vmem>>, %arg3: memref<1x128xf32, #tpu.memory_space<vmem>>, %arg4: memref<128x64xbf16, #tpu.memory_space<vmem>>, %arg5: memref<1x64xf32, #tpu.memory_space<vmem>>, %arg6: memref<64x12xbf16, #tpu.memory_space<vmem>>, %arg7: memref<1x12xf32, #tpu.memory_space<vmem>>, %arg8: memref<12x12xbf16, #tpu.memory_space<vmem>>, %arg9: memref<1x12xf32, #tpu.memory_space<vmem>>, %arg10: memref<12x64xbf16, #tpu.memory_space<vmem>>, %arg11: memref<1x64xf32, #tpu.memory_space<vmem>>, %arg12: memref<64x128xbf16, #tpu.memory_space<vmem>>, %arg13: memref<1x128xf32, #tpu.memory_space<vmem>>, %arg14: memref<128x784xbf16, #tpu.memory_space<vmem>>, %arg15: memref<1x784xf32, #tpu.memory_space<vmem>>, %arg16: memref<8x784xf32, #tpu.memory_space<vmem>>) attributes {dimension_semantics = [#tpu.dimension_semantics<parallel>], iteration_bounds = array<i64: 1>, scalar_prefetch = 0 : i64, scratch_operands = 0 : i64, tpu.core_type = #tpu.core_type<tc>, window_params = [{transform_indices = @transform_0, window_bounds = array<i64: 8, 784>}, {pipeline_mode = #tpu.pipeline_mode<synchronous>, transform_indices = @transform_1, window_bounds = array<i64: 784, 128>}, {pipeline_mode = #tpu.pipeline_mode<synchronous>, transform_indices = @transform_2, window_bounds = array<i64: 1, 128>}, {pipeline_mode = #tpu.pipeline_mode<synchronous>, transform_indices = @transform_3, window_bounds = array<i64: 128, 64>}, {pipeline_mode = #tpu.pipeline_mode<synchronous>, transform_indices = @transform_4, window_bounds = array<i64: 1, 64>}, {pipeline_mode = #tpu.pipeline_mode<synchronous>, transform_indices = @transform_5, window_bounds = array<i64: 64, 12>}, {pipeline_mode = #tpu.pipeline_mode<synchronous>, transform_indices = @transform_6, window_bounds = array<i64: 1, 12>}, {pipeline_mode = #tpu.pipeline_mode<synchronous>, transform_indices = @transform_7, window_bounds = array<i64: 12, 12>}, {pipeline_mode = #tpu.pipeline_mode<synchronous>, transform_indices = @transform_8, window_bounds = array<i64: 1, 12>}, {pipeline_mode = #tpu.pipeline_mode<synchronous>, transform_indices = @transform_9, window_bounds = array<i64: 12, 64>}, {pipeline_mode = #tpu.pipeline_mode<synchronous>, transform_indices = @transform_10, window_bounds = array<i64: 1, 64>}, {pipeline_mode = #tpu.pipeline_mode<synchronous>, transform_indices = @transform_11, window_bounds = array<i64: 64, 128>}, {pipeline_mode = #tpu.pipeline_mode<synchronous>, transform_indices = @transform_12, window_bounds = array<i64: 1, 128>}, {pipeline_mode = #tpu.pipeline_mode<synchronous>, transform_indices = @transform_13, window_bounds = array<i64: 128, 784>}, {pipeline_mode = #tpu.pipeline_mode<synchronous>, transform_indices = @transform_14, window_bounds = array<i64: 1, 784>}, {transform_indices = @transform_15, window_bounds = array<i64: 8, 784>}]} {
    %c0 = arith.constant 0 : index
    %c0_0 = arith.constant 0 : index
    %0 = vector.load %arg1[%c0, %c0_0] : memref<8x784xf32, #tpu.memory_space<vmem>>, vector<8x784xf32>
    %1 = arith.truncf %0 : vector<8x784xf32> to vector<8x784xbf16>
    %c0_1 = arith.constant 0 : index
    %c0_2 = arith.constant 0 : index
    %2 = vector.load %arg2[%c0_1, %c0_2] : memref<784x128xbf16, #tpu.memory_space<vmem>>, vector<784x128xbf16>
    %c0_3 = arith.constant 0 : index
    %c0_4 = arith.constant 0 : index
    %3 = vector.load %arg3[%c0_3, %c0_4] : memref<1x128xf32, #tpu.memory_space<vmem>>, vector<1x128xf32>
    %cst = arith.constant dense<0.000000e+00> : vector<8x128xf32>
    %4 = tpu.matmul %1, %2, %cst {dimension_numbers = #tpu.dot_dimension_numbers<[1], [0], [0], [1], [0, 0, 1, 1], [], []>} : vector<8x784xbf16>, vector<784x128xbf16>, vector<8x128xf32> -> vector<8x128xf32>
    %5 = vector.broadcast %3 : vector<1x128xf32> to vector<8x128xf32>
    %6 = arith.addf %4, %5 : vector<8x128xf32>
    %cst_5 = arith.constant 0.000000e+00 : f32
    %7 = vector.broadcast %cst_5 : f32 to vector<8x128xf32>
    %8 = arith.maximumf %6, %7 : vector<8x128xf32>
    %9 = arith.truncf %8 : vector<8x128xf32> to vector<8x128xbf16>
    %c0_6 = arith.constant 0 : index
    %c0_7 = arith.constant 0 : index
    %10 = vector.load %arg4[%c0_6, %c0_7] : memref<128x64xbf16, #tpu.memory_space<vmem>>, vector<128x64xbf16>
    %c0_8 = arith.constant 0 : index
    %c0_9 = arith.constant 0 : index
    %11 = vector.load %arg5[%c0_8, %c0_9] : memref<1x64xf32, #tpu.memory_space<vmem>>, vector<1x64xf32>
    %cst_10 = arith.constant dense<0.000000e+00> : vector<8x64xf32>
    %12 = tpu.matmul %9, %10, %cst_10 {dimension_numbers = #tpu.dot_dimension_numbers<[1], [0], [0], [1], [0, 0, 1, 1], [], []>} : vector<8x128xbf16>, vector<128x64xbf16>, vector<8x64xf32> -> vector<8x64xf32>
    %13 = vector.broadcast %11 : vector<1x64xf32> to vector<8x64xf32>
    %14 = arith.addf %12, %13 : vector<8x64xf32>
    %cst_11 = arith.constant 0.000000e+00 : f32
    %15 = vector.broadcast %cst_11 : f32 to vector<8x64xf32>
    %16 = arith.maximumf %14, %15 : vector<8x64xf32>
    %17 = arith.truncf %16 : vector<8x64xf32> to vector<8x64xbf16>
    %c0_12 = arith.constant 0 : index
    %c0_13 = arith.constant 0 : index
    %18 = vector.load %arg6[%c0_12, %c0_13] : memref<64x12xbf16, #tpu.memory_space<vmem>>, vector<64x12xbf16>
    %c0_14 = arith.constant 0 : index
    %c0_15 = arith.constant 0 : index
    %19 = vector.load %arg7[%c0_14, %c0_15] : memref<1x12xf32, #tpu.memory_space<vmem>>, vector<1x12xf32>
    %cst_16 = arith.constant dense<0.000000e+00> : vector<8x12xf32>
    %20 = tpu.matmul %17, %18, %cst_16 {dimension_numbers = #tpu.dot_dimension_numbers<[1], [0], [0], [1], [0, 0, 1, 1], [], []>} : vector<8x64xbf16>, vector<64x12xbf16>, vector<8x12xf32> -> vector<8x12xf32>
    %21 = vector.broadcast %19 : vector<1x12xf32> to vector<8x12xf32>
    %22 = arith.addf %20, %21 : vector<8x12xf32>
    %cst_17 = arith.constant 0.000000e+00 : f32
    %23 = vector.broadcast %cst_17 : f32 to vector<8x12xf32>
    %24 = arith.maximumf %22, %23 : vector<8x12xf32>
    %25 = arith.truncf %24 : vector<8x12xf32> to vector<8x12xbf16>
    %c0_18 = arith.constant 0 : index
    %c0_19 = arith.constant 0 : index
    %26 = vector.load %arg8[%c0_18, %c0_19] : memref<12x12xbf16, #tpu.memory_space<vmem>>, vector<12x12xbf16>
    %c0_20 = arith.constant 0 : index
    %c0_21 = arith.constant 0 : index
    %27 = vector.load %arg9[%c0_20, %c0_21] : memref<1x12xf32, #tpu.memory_space<vmem>>, vector<1x12xf32>
    %cst_22 = arith.constant dense<0.000000e+00> : vector<8x12xf32>
    %28 = tpu.matmul %25, %26, %cst_22 {dimension_numbers = #tpu.dot_dimension_numbers<[1], [0], [0], [1], [0, 0, 1, 1], [], []>} : vector<8x12xbf16>, vector<12x12xbf16>, vector<8x12xf32> -> vector<8x12xf32>
    %29 = vector.broadcast %27 : vector<1x12xf32> to vector<8x12xf32>
    %30 = arith.addf %28, %29 : vector<8x12xf32>
    %cst_23 = arith.constant 0.000000e+00 : f32
    %31 = vector.broadcast %cst_23 : f32 to vector<8x12xf32>
    %32 = arith.maximumf %30, %31 : vector<8x12xf32>
    %33 = arith.truncf %32 : vector<8x12xf32> to vector<8x12xbf16>
    %c0_24 = arith.constant 0 : index
    %c0_25 = arith.constant 0 : index
    %34 = vector.load %arg10[%c0_24, %c0_25] : memref<12x64xbf16, #tpu.memory_space<vmem>>, vector<12x64xbf16>
    %c0_26 = arith.constant 0 : index
    %c0_27 = arith.constant 0 : index
    %35 = vector.load %arg11[%c0_26, %c0_27] : memref<1x64xf32, #tpu.memory_space<vmem>>, vector<1x64xf32>
    %cst_28 = arith.constant dense<0.000000e+00> : vector<8x64xf32>
    %36 = tpu.matmul %33, %34, %cst_28 {dimension_numbers = #tpu.dot_dimension_numbers<[1], [0], [0], [1], [0, 0, 1, 1], [], []>} : vector<8x12xbf16>, vector<12x64xbf16>, vector<8x64xf32> -> vector<8x64xf32>
    %37 = vector.broadcast %35 : vector<1x64xf32> to vector<8x64xf32>
    %38 = arith.addf %36, %37 : vector<8x64xf32>
    %cst_29 = arith.constant 0.000000e+00 : f32
    %39 = vector.broadcast %cst_29 : f32 to vector<8x64xf32>
    %40 = arith.maximumf %38, %39 : vector<8x64xf32>
    %41 = arith.truncf %40 : vector<8x64xf32> to vector<8x64xbf16>
    %c0_30 = arith.constant 0 : index
    %c0_31 = arith.constant 0 : index
    %42 = vector.load %arg12[%c0_30, %c0_31] : memref<64x128xbf16, #tpu.memory_space<vmem>>, vector<64x128xbf16>
    %c0_32 = arith.constant 0 : index
    %c0_33 = arith.constant 0 : index
    %43 = vector.load %arg13[%c0_32, %c0_33] : memref<1x128xf32, #tpu.memory_space<vmem>>, vector<1x128xf32>
    %cst_34 = arith.constant dense<0.000000e+00> : vector<8x128xf32>
    %44 = tpu.matmul %41, %42, %cst_34 {dimension_numbers = #tpu.dot_dimension_numbers<[1], [0], [0], [1], [0, 0, 1, 1], [], []>} : vector<8x64xbf16>, vector<64x128xbf16>, vector<8x128xf32> -> vector<8x128xf32>
    %45 = vector.broadcast %43 : vector<1x128xf32> to vector<8x128xf32>
    %46 = arith.addf %44, %45 : vector<8x128xf32>
    %cst_35 = arith.constant 0.000000e+00 : f32
    %47 = vector.broadcast %cst_35 : f32 to vector<8x128xf32>
    %48 = arith.maximumf %46, %47 : vector<8x128xf32>
    %49 = arith.truncf %48 : vector<8x128xf32> to vector<8x128xbf16>
    %c0_36 = arith.constant 0 : index
    %c0_37 = arith.constant 0 : index
    %50 = vector.load %arg14[%c0_36, %c0_37] : memref<128x784xbf16, #tpu.memory_space<vmem>>, vector<128x784xbf16>
    %c0_38 = arith.constant 0 : index
    %c0_39 = arith.constant 0 : index
    %51 = vector.load %arg15[%c0_38, %c0_39] : memref<1x784xf32, #tpu.memory_space<vmem>>, vector<1x784xf32>
    %cst_40 = arith.constant dense<0.000000e+00> : vector<8x784xf32>
    %52 = tpu.matmul %49, %50, %cst_40 {dimension_numbers = #tpu.dot_dimension_numbers<[1], [0], [0], [1], [0, 0, 1, 1], [], []>} : vector<8x128xbf16>, vector<128x784xbf16>, vector<8x784xf32> -> vector<8x784xf32>
    %53 = vector.broadcast %51 : vector<1x784xf32> to vector<8x784xf32>
    %54 = arith.addf %52, %53 : vector<8x784xf32>
    %c0_41 = arith.constant 0 : index
    %c0_42 = arith.constant 0 : index
    %55 = vector.load %arg16[%c0_41, %c0_42] : memref<8x784xf32, #tpu.memory_space<vmem>>, vector<8x784xf32>
    tpu.vector_store %arg16[%c0_41, %c0_42], %54 {strides = array<i32>} : memref<8x784xf32, #tpu.memory_space<vmem>>, vector<8x784xf32>,
    return
  }
  func.func @transform_0(%arg0: i32) -> (i32, i32) {
    %c0_i32 = arith.constant 0 : i32
    %c0_i32_0 = arith.constant 0 : i32
    return %arg0, %c0_i32 : i32, i32
  }
  func.func @transform_1(%arg0: i32) -> (i32, i32) {
    %c0_i32 = arith.constant 0 : i32
    %c0_i32_0 = arith.constant 0 : i32
    %c0_i32_1 = arith.constant 0 : i32
    return %c0_i32, %c0_i32_0 : i32, i32
  }
  func.func @transform_2(%arg0: i32) -> (i32, i32) {
    %c0_i32 = arith.constant 0 : i32
    %c0_i32_0 = arith.constant 0 : i32
    %c0_i32_1 = arith.constant 0 : i32
    return %c0_i32, %c0_i32_0 : i32, i32
  }
  func.func @transform_3(%arg0: i32) -> (i32, i32) {
    %c0_i32 = arith.constant 0 : i32
    %c0_i32_0 = arith.constant 0 : i32
    %c0_i32_1 = arith.constant 0 : i32
    return %c0_i32, %c0_i32_0 : i32, i32
  }
  func.func @transform_4(%arg0: i32) -> (i32, i32) {
    %c0_i32 = arith.constant 0 : i32
    %c0_i32_0 = arith.constant 0 : i32
    %c0_i32_1 = arith.constant 0 : i32
    return %c0_i32, %c0_i32_0 : i32, i32
  }
  func.func @transform_5(%arg0: i32) -> (i32, i32) {
    %c0_i32 = arith.constant 0 : i32
    %c0_i32_0 = arith.constant 0 : i32
    %c0_i32_1 = arith.constant 0 : i32
    return %c0_i32, %c0_i32_0 : i32, i32
  }
  func.func @transform_6(%arg0: i32) -> (i32, i32) {
    %c0_i32 = arith.constant 0 : i32
    %c0_i32_0 = arith.constant 0 : i32
    %c0_i32_1 = arith.constant 0 : i32
    return %c0_i32, %c0_i32_0 : i32, i32
  }
  func.func @transform_7(%arg0: i32) -> (i32, i32) {
    %c0_i32 = arith.constant 0 : i32
    %c0_i32_0 = arith.constant 0 : i32
    %c0_i32_1 = arith.constant 0 : i32
    return %c0_i32, %c0_i32_0 : i32, i32
  }
  func.func @transform_8(%arg0: i32) -> (i32, i32) {
    %c0_i32 = arith.constant 0 : i32
    %c0_i32_0 = arith.constant 0 : i32
    %c0_i32_1 = arith.constant 0 : i32
    return %c0_i32, %c0_i32_0 : i32, i32
  }
  func.func @transform_9(%arg0: i32) -> (i32, i32) {
    %c0_i32 = arith.constant 0 : i32
    %c0_i32_0 = arith.constant 0 : i32
    %c0_i32_1 = arith.constant 0 : i32
    return %c0_i32, %c0_i32_0 : i32, i32
  }
  func.func @transform_10(%arg0: i32) -> (i32, i32) {
    %c0_i32 = arith.constant 0 : i32
    %c0_i32_0 = arith.constant 0 : i32
    %c0_i32_1 = arith.constant 0 : i32
    return %c0_i32, %c0_i32_0 : i32, i32
  }
  func.func @transform_11(%arg0: i32) -> (i32, i32) {
    %c0_i32 = arith.constant 0 : i32
    %c0_i32_0 = arith.constant 0 : i32
    %c0_i32_1 = arith.constant 0 : i32
    return %c0_i32, %c0_i32_0 : i32, i32
  }
  func.func @transform_12(%arg0: i32) -> (i32, i32) {
    %c0_i32 = arith.constant 0 : i32
    %c0_i32_0 = arith.constant 0 : i32
    %c0_i32_1 = arith.constant 0 : i32
    return %c0_i32, %c0_i32_0 : i32, i32
  }
  func.func @transform_13(%arg0: i32) -> (i32, i32) {
    %c0_i32 = arith.constant 0 : i32
    %c0_i32_0 = arith.constant 0 : i32
    %c0_i32_1 = arith.constant 0 : i32
    return %c0_i32, %c0_i32_0 : i32, i32
  }
  func.func @transform_14(%arg0: i32) -> (i32, i32) {
    %c0_i32 = arith.constant 0 : i32
    %c0_i32_0 = arith.constant 0 : i32
    %c0_i32_1 = arith.constant 0 : i32
    return %c0_i32, %c0_i32_0 : i32, i32
  }
  func.func @transform_15(%arg0: i32) -> (i32, i32) {
    %c0_i32 = arith.constant 0 : i32
    %c0_i32_0 = arith.constant 0 : i32
    return %arg0, %c0_i32 : i32, i32
  }
}

</mosaic_0001>

<bundles_post_ra>
// kernel: linear_ae_forward.1
= control target key start
LH: loop header
LB: loop body
LE: loop exit
PB: predicated region body
PF: predicated region fallthrough
CT: control target
= control target key end

     0   :  { %20 = vsyncpa [#allocation3], 0  ;;  %v2163_v43 = vmov 0.0   ;;  %vm2164_vm0 = vmmov 0   ;;  %vm488_vm1 = vcmask 130048   ;;  %vm870_vm2 = vcmask 1045504   ;;  %s2719_s0 = inlined_call_operand.vmem [shape: f32[4,784], index: 0, kind: input, shape index: {}]   ;;  %s2720_s1 = inlined_call_operand.vmem [shape: bf16[784,128], index: 1, kind: input, shape index: {}]   ;;  %s2721_s2 = inlined_call_operand.vmem [shape: f32[1,128], index: 2, kind: input, shape index: {}]   ;;  %s2722_s3 = inlined_call_operand.vmem [shape: bf16[128,64], index: 3, kind: input, shape index: {}]   ;;  %s2723_s4 = inlined_call_operand.vmem [shape: f32[1,64], index: 4, kind: input, shape index: {}]   ;;  %s2724_s5 = inlined_call_operand.vmem [shape: bf16[64,12], index: 5, kind: input, shape index: {}]   ;;  %s2725_s6 = inlined_call_operand.vmem [shape: f32[1,12], index: 6, kind: input, shape index: {}]   ;;  %s2726_s7 = inlined_call_operand.vmem [shape: bf16[12,12], index: 7, kind: input, shape index: {}]   ;;  %s2727_s8 = inlined_call_operand.vmem [shape: f32[1,12], index: 8, kind: input, shape index: {}]   ;;  %s2728_s9 = inlined_call_operand.vmem [shape: bf16[12,64], index: 9, kind: input, shape index: {}]   ;;  %s2729_s10 = inlined_call_operand.vmem [shape: f32[1,64], index: 10, kind: input, shape index: {}]   ;;  %s2730_s11 = inlined_call_operand.vmem [shape: bf16[64,128], index: 11, kind: input, shape index: {}]   ;;  %s2731_s12 = inlined_call_operand.vmem [shape: f32[1,128], index: 12, kind: input, shape index: {}]   ;;  %s2732_s13 = inlined_call_operand.vmem [shape: bf16[128,784], index: 13, kind: input, shape index: {}]   ;;  %s2733_s14 = inlined_call_operand.vmem [shape: f32[1,784], index: 14, kind: input, shape index: {}]   ;;  %s2734_s15 = inlined_call_operand.hbm [shape: f32[4,784], index: 15, kind: output, shape index: {}]  }
   0x1   :  { %v1982_v0 = vld [vmem:[%s2720_s1 + $0x40] sm:$0xff]   ;;  %v1986_v4 = vld [vmem:[%s2720_s1 + $0x48] sm:$0xff]   ;;  %v1990_v8 = vld [vmem:[%s2720_s1 + $0x50] sm:$0xff]   ;;  %vm806_vm3 = vcmask 523264   ;;  %vm866_vm4 = vcmask 97280   ;;  %vm1638_vm5 = vcmask 125952  }
   0x2   :  { %v1983_v1 = vld [vmem:[%s2720_s1] sm:$0xff]   ;;  %1794 = vmatprep.subr.bf16.mxu0 %v1982_v0  ;;  %v1987_v5 = vld [vmem:[%s2720_s1 + $0x8] sm:$0xff]   ;;  %v1991_v9 = vld [vmem:[%s2720_s1 + $0x10] sm:$0xff]  }
   0x3   :  { %v1984_v2 = vld [vmem:[%s2720_s1 + $0xc0] sm:$0xff]   ;;  %1795 = vmatpush3.bf16.msra.mxu0 %v1983_v1  ;;  %v1988_v6 = vld [vmem:[%s2720_s1 + $0xc8] sm:$0xff]   ;;  %v1992_v10 = vld [vmem:[%s2720_s1 + $0xd0] sm:$0xff]  }
   0x4   :  { %v1985_v3 = vld [vmem:[%s2720_s1 + $0x80] sm:$0xff]   ;;  %1816 = vmatprep.subr.bf16.mxu1 %v1984_v2  ;;  %1796 = vmatprep.subr.bf16.mxu0 %v1986_v4  ;;  %v1989_v7 = vld [vmem:[%s2720_s1 + $0x88] sm:$0xff]   ;;  %v1993_v11 = vld [vmem:[%s2720_s1 + $0x90] sm:$0xff]  }
   0x5   :  { %1817 = vmatpush3.bf16.msra.mxu1 %v1985_v3  ;;  %v1994_v12 = vld [vmem:[%s2720_s1 + $0x58] sm:$0xff]   ;;  %v1998_v16 = vld [vmem:[%s2720_s1 + $0x60] sm:$0xff]   ;;  %v2002_v20 = vld [vmem:[%s2720_s1 + $0x68] sm:$0xff]  }
   0x6   :  { %1818 = vmatprep.subr.bf16.mxu1 %v1988_v6  ;;  %v1995_v13 = vld [vmem:[%s2720_s1 + $0x18] sm:$0xff]   ;;  %v1999_v17 = vld [vmem:[%s2720_s1 + $0x20] sm:$0xff]   ;;  %v2003_v21 = vld [vmem:[%s2720_s1 + $0x28] sm:$0xff]  }
   0x7   :  { %1797 = vmatpush3.bf16.msra.mxu0 %v1987_v5  ;;  %v1996_v14 = vld [vmem:[%s2720_s1 + $0xd8] sm:$0xff]   ;;  %v2000_v18 = vld [vmem:[%s2720_s1 + $0xe0] sm:$0xff]   ;;  %v2004_v22 = vld [vmem:[%s2720_s1 + $0xe8] sm:$0xff]  }
   0x8   :  { %1798 = vmatprep.subr.bf16.mxu0 %v1990_v8  ;;  %v1997_v15 = vld [vmem:[%s2720_s1 + $0x98] sm:$0xff]   ;;  %v2001_v19 = vld [vmem:[%s2720_s1 + $0xa0] sm:$0xff]   ;;  %v2005_v23 = vld [vmem:[%s2720_s1 + $0xa8] sm:$0xff]  }
   0x9   :  { %1819 = vmatpush3.bf16.msra.mxu1 %v1989_v7  ;;  %v2006_v24 = vld [vmem:[%s2720_s1 + $0x70] sm:$0xff]   ;;  %v2010_v28 = vld [vmem:[%s2720_s1 + $0x78] sm:$0xff]   ;;  %v2015_v32 = vld [vmem:[%s2719_s0 + $0x4] ss:$28 sps:$4 sm:$0xff]  }
   0xa   :  { %1820 = vmatprep.subr.bf16.mxu1 %v1992_v10  ;;  %v2007_v25 = vld [vmem:[%s2720_s1 + $0x30] sm:$0xff]   ;;  %v2011_v29 = vld [vmem:[%s2720_s1 + $0x38] sm:$0xff]   ;;  %v83_v35 = vpack.c.bf16 %v2015_v32, %v2015_v32  ;;  %v2017_v36 = vld [vmem:[%s2720_s1 + $0x140] sm:$0xff]  }
   0xb   :  { %1799 = vmatpush3.bf16.msra.mxu0 %v1991_v9  ;;  %v2008_v26 = vld [vmem:[%s2720_s1 + $0xf0] sm:$0xff]   ;;  %v2012_v30 = vld [vmem:[%s2720_s1 + $0xf8] sm:$0xff]   ;;  %v2018_v37 = vld [vmem:[%s2719_s0 + $0x8] ss:$28 sps:$4 sm:$0xff]  }
   0xc   :  { %1800 = vmatprep.subr.bf16.mxu0 %v1994_v12  ;;  %v2009_v27 = vld [vmem:[%s2720_s1 + $0xb0] sm:$0xff]   ;;  %v2013_v31 = vld [vmem:[%s2719_s0] ss:$28 sps:$4 sm:$0xff]   ;;  %v2020_v38 = vld [vmem:[%s2719_s0 + $0xc] ss:$28 sps:$4 sm:$0xff]   ;;  %524 = vmatprep.mubr.bf16.mxu0 %v83_v35  ;;  %v84_v40 = vpack.c.bf16 %v2018_v37, %v2018_v37 }
   0xd   :  { %1821 = vmatpush3.bf16.msra.mxu1 %v1993_v11  ;;  %v2016_v33 = vld [vmem:[%s2720_s1 + $0xb8] sm:$0xff]   ;;  %v82_v34 = vpack.c.bf16 %v2013_v31, %v2013_v31  ;;  %v2021_v39 = vld [vmem:[%s2720_s1 + $0x100] sm:$0xff]   ;;  %v85_v41 = vpack.c.bf16 %v2020_v38, %v2020_v38  ;;  %v2022_v42 = vld [vmem:[%s2720_s1 + $0x148] sm:$0xff]  }
   0xe   :  { %1822 = vmatprep.subr.bf16.mxu1 %v1996_v14  ;;  %v2023_v44 = vld [vmem:[%s2720_s1 + $0x108] sm:$0xff]   ;;  %v2024_v45 = vld [vmem:[%s2720_s1 + $0x150] sm:$0xff]   ;;  %v2026_v47 = vld [vmem:[%s2720_s1 + $0x158] sm:$0xff]  }
   0xf   :  { %1801 = vmatpush3.bf16.msra.mxu0 %v1995_v13  ;;  %564 = vmatprep.mubr.bf16.mxu1 %v85_v41  ;;  %v2025_v46 = vld [vmem:[%s2720_s1 + $0x110] sm:$0xff]   ;;  %v2027_v48 = vld [vmem:[%s2720_s1 + $0x118] sm:$0xff]   ;;  %v2028_v49 = vld [vmem:[%s2720_s1 + $0x160] sm:$0xff]  }
  0x10   :  { %1802 = vmatprep.subr.bf16.mxu0 %v1998_v16  ;;  %v2029_v50 = vld [vmem:[%s2720_s1 + $0x120] sm:$0xff]   ;;  %v2030_v51 = vld [vmem:[%s2720_s1 + $0x168] sm:$0xff]   ;;  %v2032_v54 = vld [vmem:[%s2720_s1 + $0x170] sm:$0xff]  }
  0x11   :  { %1823 = vmatpush3.bf16.msra.mxu1 %v1997_v15  ;;  %v2036_v52 = vld [vmem:[%s2720_s1 + $0x180] sm:$0xff]   ;;  %v2031_v53 = vld [vmem:[%s2720_s1 + $0x128] sm:$0xff]   ;;  %v2039_v55 = vld [vmem:[%s2719_s0 + $0x14] ss:$28 sps:$4 sm:$0xff]  }
  0x12   :  { %1824 = vmatprep.subr.bf16.mxu1 %v2000_v18  ;;  %v2040_v56 = vld [vmem:[%s2719_s0 + $0x18] ss:$28 sps:$4 sm:$0xff]   ;;  %v87_v57 = vpack.c.bf16 %v2039_v55, %v2039_v55  ;;  %v2037_v61 = vld [vmem:[%s2719_s0 + $0x10] ss:$28 sps:$4 sm:$0xff]   ;;  %v2041_v0 = vld [vmem:[%s2722_s3] sm:$0xff]  }
  0x13   :  { %1803 = vmatpush3.bf16.msra.mxu0 %v1999_v17  ;;  %v2033_v58 = vld [vmem:[%s2720_s1 + $0x130] sm:$0xff]   ;;  %v88_v59 = vpack.c.bf16 %v2040_v56, %v2040_v56  ;;  %v2034_v60 = vld [vmem:[%s2720_s1 + $0x178] sm:$0xff]   ;;  %v86_v63 = vpack.c.bf16 %v2037_v61, %v2037_v61  ;;  %v2042_v1 = vld [vmem:[%s2722_s3 + $0x8] sm:$0xff]  }
  0x14   :  { %1804 = vmatprep.subr.bf16.mxu0 %v2002_v20  ;;  %v2035_v62 = vld [vmem:[%s2720_s1 + $0x138] sm:$0xff]   ;;  %v2043_v2 = vld [vmem:[%s2722_s3 + $0x10] sm:$0xff]   ;;  %v2045_v4 = vld [vmem:[%s2722_s3 + $0x20] sm:$0xff]  }
  0x15   :  { %1825 = vmatpush3.bf16.msra.mxu1 %v2001_v19  ;;  %v2044_v3 = vld [vmem:[%s2722_s3 + $0x18] sm:$0xff]   ;;  %v2046_v5 = vld [vmem:[%s2722_s3 + $0x28] sm:$0xff]   ;;  %v2047_v6 = vld [vmem:[%s2722_s3 + $0x30] sm:$0xff]  }
  0x16   :  { %1826 = vmatprep.subr.bf16.mxu1 %v2004_v22  ;;  %v2048_v7 = vld [vmem:[%s2722_s3 + $0x38] sm:$0xff]   ;;  %v2049_v8 = vld [vmem:[%s2724_s5] sm:$0xff]   ;;  %v2050_v9 = vld [vmem:[%s2724_s5 + $0x8] sm:$0xff]  }
  0x17   :  { %1805 = vmatpush3.bf16.msra.mxu0 %v2003_v21  ;;  %v1660_v11 = vld [vmem:[%s2721_s2] ss:$0 sm:$0xff]  ;;  %v2052_v37 = vld [vmem:[%s2724_s5 + $0x18] sm:$0xff]  }
  0x18   :  { %1806 = vmatprep.subr.bf16.mxu0 %v2006_v24  ;;  %v2053_v38 = vld [vmem:[%s2726_s7] sm:$0x3f]  }
  0x19   :  { %1827 = vmatpush3.bf16.msra.mxu1 %v2005_v23  ;;  %v1726_v61 = vld [vmem:[%s2727_s8] ss:$0 sm:$0xff] }
  0x1a   :  { %1828 = vmatprep.subr.bf16.mxu1 %v2008_v26 }
  0x1b   :  { %1807 = vmatpush3.bf16.msra.mxu0 %v2007_v25 }
  0x1c   :  { %1808 = vmatprep.subr.bf16.mxu0 %v2010_v28 }
  0x1d   :  { %1829 = vmatpush3.bf16.msra.mxu1 %v2009_v27 }
  0x1e   :  { %1830 = vmatprep.subr.bf16.mxu1 %v2012_v30 }
  0x1f   :  { %1809 = vmatpush3.bf16.msra.mxu0 %v2011_v29 }
  0x20   :  { %1838 = vmatprep.subr.bf16.mxu0 %v2017_v36  ;;  %v2051_v36 = vld [vmem:[%s2724_s5 + $0x10] sm:$0xff]  }
  0x21   :  { %1831 = vmatpush3.bf16.msra.mxu1 %v2016_v33 }
  0x22   :  { %525 = vmatmul.mubr.bf16.vlgmr.msra.gmra.mrb[0].mxu0 %v82_v34  ;;  %1894 = vmatprep.subr.bf16.mxu1 %v2163_v43 }
  0x23   :  { %1839 = vmatpush3.bf16.msra.mxu0 %v2021_v39  ;;  %604 = vmatprep.mubr.bf16.mxu0 %v87_v57  ;;  %v872_v39 = vsel %vm870_vm2, %v2053_v38, 0  ;;  %v2086_v38 = vld [vmem:[%s2732_s13 + $0xe8] ss:$28 sps:$4 sm:$0xff]  }
  0x24   :  { %1840 = vmatprep.subr.bf16.mxu0 %v2022_v42  ;;  %565 = vmatmul.mubr.bf16.vlgmr.msra.gmra.mrb[0].mxu1 %v84_v40  ;;  %v1711_v40 = vld [vmem:[%s2723_s4] ss:$0 sm:$0xff] }
  0x25   :  { %1896 = vmatprep.mubr.msk.bf16.mxu1 %vm2164_vm0, %v2163_v43  ;;  %1895 = vmatpush3.bf16.msra.mxu1 %v2036_v52 }
  0x26   :  { %1900 = vmatprep.subr.bf16.mxu1 %v2163_v43 }
  0x27   :  { %1841 = vmatpush3.bf16.msra.mxu0 %v2023_v44 }
  0x28   :  { %1842 = vmatprep.subr.bf16.mxu0 %v2024_v45 }
  0x2b   :  { %1843 = vmatpush3.bf16.msra.mxu0 %v2025_v46 }
  0x2c   :  { %1844 = vmatprep.subr.bf16.mxu0 %v2026_v47  ;;  %1897 = vmatmul.mubr.msk.bf16.vlgmr.msra.gmra.mrb[4].mxu1 %vm488_vm1, %v88_v59  ;;  %v2055_v59 = vld [vmem:[%s2730_s11] sm:$0xff]  }
  0x2d   :  { %1916 = vmatprep.mubr.msk.bf16.mxu1 %vm2164_vm0, %v2163_v43  ;;  %1901 = vmatpush3.bf16.msra.mxu1 %v2041_v0 }
  0x2e   :  { %1902 = vmatprep.subr.bf16.mxu1 %v2163_v43 }
  0x2f   :  { %1845 = vmatpush3.bf16.msra.mxu0 %v2027_v48 }
  0x30   :  { %1846 = vmatprep.subr.bf16.mxu0 %v2028_v49  ;;  %v2054_v49 = vld [vmem:[%s2728_s9] sm:$0x3f]  }
  0x31   :  { %1903 = vmatpush3.bf16.msra.mxu1 %v2042_v1 }
  0x32   :  { %1904 = vmatprep.subr.bf16.mxu1 %v2163_v43 }
  0x33   :  { %1847 = vmatpush3.bf16.msra.mxu0 %v2029_v50  ;;  %v934_v50 = vsel %vm870_vm2, %v2054_v49, 0  ;;  %v2165_v49 = vmov 0  }
  0x34   :  { %1848 = vmatprep.subr.bf16.mxu0 %v2030_v51  ;;  %v1720_v51 = vld [vmem:[%s2725_s6] ss:$0 sm:$0xff] }
  0x35   :  { %1905 = vmatpush3.bf16.msra.mxu1 %v2043_v2 }
  0x36   :  { %1906 = vmatprep.subr.bf16.mxu1 %v2163_v43 }
  0x37   :  { %1849 = vmatpush3.bf16.msra.mxu0 %v2031_v53 }
  0x38   :  { %1850 = vmatprep.subr.bf16.mxu0 %v2032_v54 }
  0x39   :  { %1907 = vmatpush3.bf16.msra.mxu1 %v2044_v3 }
  0x3a   :  { %1908 = vmatprep.subr.bf16.mxu1 %v2163_v43 }
  0x3b   :  { %1851 = vmatpush3.bf16.msra.mxu0 %v2033_v58 }
  0x3c   :  { %1852 = vmatprep.subr.bf16.mxu0 %v2034_v60  ;;  %v2056_v60 = vld [vmem:[%s2730_s11 + $0x8] sm:$0xff]  }
  0x3d   :  { %1909 = vmatpush3.bf16.msra.mxu1 %v2045_v4 }
  0x3e   :  { %1910 = vmatprep.subr.bf16.mxu1 %v2163_v43 }
  0x3f   :  { %1853 = vmatpush3.bf16.msra.mxu0 %v2035_v62 }
  0x40   :  { %1920 = vmatprep.subr.bf16.mxu0 %v2163_v43 }
  0x41   :  { %1911 = vmatpush3.bf16.msra.mxu1 %v2046_v5  ;;  %v2057_v5 = vld [vmem:[%s2730_s11 + $0x10] sm:$0xff]  }
  0x42   :  { %605 = vmatmul.mubr.bf16.vlgmr.msra.gmra.mrb[4].mxu0 %v86_v63  ;;  %1912 = vmatprep.subr.bf16.mxu1 %v2163_v43 }
  0x43   :  { %1928 = vmatprep.mubr.msk.bf16.mxu0 %vm2164_vm0, %v2163_v43  ;;  %1921 = vmatpush3.bf16.msra.mxu0 %v2049_v8  ;;  %v2061_v8 = vld [vmem:[%s2732_s13 + $0x4] ss:$28 sps:$4 sm:$0xff]  }
  0x44   :  { %1922 = vmatprep.subr.bf16.mxu0 %v2163_v43 }
  0x45   :  { %1913 = vmatpush3.bf16.msra.mxu1 %v2047_v6  ;;  %v2058_v6 = vld [vmem:[%s2730_s11 + $0x18] sm:$0xff]  }
  0x46   :  { %1914 = vmatprep.subr.bf16.mxu1 %v2163_v43 }
  0x47   :  { %1923 = vmatpush3.bf16.msra.mxu0 %v2050_v9  ;;  %v2064_v9 = vld [vmem:[%s2732_s13 + $0xc] ss:$28 sps:$4 sm:$0xff]  }
  0x48   :  { %1924 = vmatprep.subr.bf16.mxu0 %v2163_v43 }
  0x49   :  { %1915 = vmatpush3.bf16.msra.mxu1 %v2048_v7  ;;  %v2059_v7 = vld [vmem:[%s2732_s13] ss:$28 sps:$4 sm:$0xff]  }
  0x4a   :  { %1932 = vmatprep.subr.bf16.mxu1 %v2163_v43 }
  0x4b   :  { %1925 = vmatpush3.bf16.msra.mxu0 %v2051_v36  ;;  %v2080_v36 = vld [vmem:[%s2732_s13 + $0xb0] ss:$28 sps:$4 sm:$0xff]  }
  0x4c   :  { %1926 = vmatprep.subr.bf16.mxu0 %v2163_v43 }
  0x4f   :  { %1927 = vmatpush3.bf16.msra.mxu0 %v2052_v37  ;;  %v2088_v37 = vld [vmem:[%s2732_s13 + $0xec] ss:$28 sps:$4 sm:$0xff]  }
  0x50   :  { %1938 = vmatprep.subr.bf16.mxu0 %v2163_v43 }
  0xf5   :  { %v1810_v10 = vpop.f32.mrb[0].mxu0 }
  0xf6   :  { %v1811_v12 = vpop.f32.mrb[1].mxu0 }
  0xf7   :  { %v1812_v13 = vadd.f32 %v1811_v12, %v1810_v10  ;;  %v1813_v14 = vpop.f32.mrb[2].mxu0  ;;  %v1832_v15 = vpop.f32.mrb[0].mxu1  ;;  %v2067_v10 = vld [vmem:[%s2732_s13 + $0x3c] ss:$28 sps:$4 sm:$0xff]   ;;  %v2073_v12 = vld [vmem:[%s2732_s13 + $0x74] ss:$28 sps:$4 sm:$0xff]  }
  0xf8   :  { %v1814_v16 = vpop.f32.mrb[3].mxu0  ;;  %v1833_v18 = vpop.f32.mrb[1].mxu1  ;;  %v2079_v14 = vld [vmem:[%s2732_s13 + $0xac] ss:$28 sps:$4 sm:$0xff]  }
  0xf9   :  { %v527_v17 = vadd.f32 %v1812_v13, %v1660_v11  ;;  %v1834_v19 = vadd.f32 %v1833_v18, %v1832_v15  ;;  %v1835_v20 = vpop.f32.mrb[2].mxu1  ;;  %v2065_v11 = vld [vmem:[%s2732_s13 + $0x38] ss:$28 sps:$4 sm:$0xff]   ;;  %v2071_v13 = vld [vmem:[%s2732_s13 + $0x70] ss:$28 sps:$4 sm:$0xff]  }
  0xfa   :  { %v1836_v21 = vpop.f32.mrb[3].mxu1  ;;  %v2077_v15 = vld [vmem:[%s2732_s13 + $0xa8] ss:$28 sps:$4 sm:$0xff]   ;;  %v2091_v18 = vld [vmem:[%s2732_s13 + $0x11c] ss:$28 sps:$4 sm:$0xff]  }
  0xfb   :  { %v567_v22 = vadd.f32 %v1834_v19, %v527_v17  ;;  %v2085_v16 = vld [vmem:[%s2732_s13 + $0xe4] ss:$28 sps:$4 sm:$0xff]   ;;  %v2089_v19 = vld [vmem:[%s2732_s13 + $0x118] ss:$28 sps:$4 sm:$0xff]   ;;  %v2095_v21 = vld [vmem:[%s2732_s13 + $0x150] ss:$28 sps:$4 sm:$0xff]  }
  0xfc   :  { %v2083_v17 = vld [vmem:[%s2732_s13 + $0xe0] ss:$28 sps:$4 sm:$0xff]   ;;  %v2097_v20 = vld [vmem:[%s2732_s13 + $0x154] ss:$28 sps:$4 sm:$0xff]  }
  0xff   :  { %v646_v23 = vpop.f32.mrb[4].mxu1 }
 0x100   :  { %v1898_v24 = vpop.f32.mrb[5].mxu1 }
 0x101   :  { %v649_v25 = vpop.f32.mrb[6].mxu1 }
 0x102   :  { %v1899_v26 = vpop.f32.mrb[7].mxu1 }
 0x115   :  { %v1854_v27 = vpop.f32.mrb[4].mxu0 }
 0x116   :  { %v1855_v28 = vpop.f32.mrb[5].mxu0 }
 0x117   :  { %v1856_v29 = vadd.f32 %v1855_v28, %v1854_v27  ;;  %v1857_v30 = vpop.f32.mrb[6].mxu0 }
 0x118   :  { %v1858_v31 = vpop.f32.mrb[7].mxu0 }
 0x119   :  { %v607_v32 = vadd.f32 %v1856_v29, %v567_v22  ;;  %v1729_v22 = vld [vmem:[%s2729_s10] ss:$0 sm:$0xff]  ;;  %v2062_v29 = vld [vmem:[%s2732_s13 + $0x8] ss:$28 sps:$4 sm:$0xff]  }
 0x11a   :  { %v2070_v31 = vld [vmem:[%s2732_s13 + $0x44] ss:$28 sps:$4 sm:$0xff]  }
 0x11b   :  { %v647_v33 = vadd.f32 %v646_v23, %v607_v32  ;;  %v2068_v32 = vld [vmem:[%s2732_s13 + $0x40] ss:$28 sps:$4 sm:$0xff]  }
 0x11d   :  { %v652_v34 = vmax.f32 %v647_v33, 0.0  ;;  %v2076_v33 = vld [vmem:[%s2732_s13 + $0x7c] ss:$28 sps:$4 sm:$0xff]  }
 0x11f   :  { %v653_v35 = vpack.c.bf16 %v652_v34, %v652_v34  ;;  %v2074_v34 = vld [vmem:[%s2732_s13 + $0x78] ss:$28 sps:$4 sm:$0xff]  }
 0x121   :  { %1917 = vmatmul.mubr.bf16.vlgmr.msra.gmra.mrb[8].mxu1 %v653_v35  ;;  %v2082_v35 = vld [vmem:[%s2732_s13 + $0xb4] ss:$28 sps:$4 sm:$0xff]  }
 0x122   :  { %1934 = vmatprep.mubr.msk.bf16.mxu1 %vm2164_vm0, %v2163_v43  ;;  %1933 = vmatpush3.bf16.msra.mxu1 %v872_v39  ;;  %v2094_v39 = vld [vmem:[%s2732_s13 + $0x124] ss:$28 sps:$4 sm:$0xff]  }
 0x123   :  { %1944 = vmatprep.subr.bf16.mxu1 %v2163_v43 }
 0x1f4   :  { %v759_v41 = vpop.f32.mrb[8].mxu1 }
 0x1f5   :  { %v760_v42 = vadd.f32 %v1711_v40, %v759_v41  ;;  %v1918_v44 = vpop.f32.mrb[9].mxu1  ;;  %v2092_v40 = vld [vmem:[%s2732_s13 + $0x120] ss:$28 sps:$4 sm:$0xff]  }
 0x1f6   :  { %v762_v45 = vpop.f32.mrb[10].mxu1  ;;  %v2100_v41 = vld [vmem:[%s2732_s13 + $0x15c] ss:$28 sps:$4 sm:$0xff]   ;;  %v2103_v44 = vld [vmem:[%s2732_s13 + $0x18c] ss:$28 sps:$4 sm:$0xff]  }
 0x1f7   :  { %v765_v46 = vmax.f32 %v760_v42, 0.0  ;;  %v1919_v47 = vpop.f32.mrb[11].mxu1  ;;  %v2098_v42 = vld [vmem:[%s2732_s13 + $0x158] ss:$28 sps:$4 sm:$0xff]  }
 0x1f8   :  { %v2106_v45 = vld [vmem:[%s2732_s13 + $0x194] ss:$28 sps:$4 sm:$0xff]  }
 0x1f9   :  { %v766_v48 = vpack.c.bf16 %v765_v46, %v765_v46  ;;  %v2101_v46 = vld [vmem:[%s2732_s13 + $0x188] ss:$28 sps:$4 sm:$0xff]   ;;  %v2104_v47 = vld [vmem:[%s2732_s13 + $0x190] ss:$28 sps:$4 sm:$0xff]  }
 0x1fb   :  { %1929 = vmatmul.mubr.msk.bf16.vlgmr.msra.gmra.mrb[8].mxu0 %vm806_vm3, %v766_v48  ;;  %v2109_v48 = vld [vmem:[%s2732_s13 + $0x14] ss:$28 sps:$4 sm:$0xff]  }
 0x1fc   :  { %1940 = vmatprep.mubr.msk.bf16.mxu0 %vm2164_vm0, %v2163_v43  ;;  %1939 = vmatpush3.bf16.msra.mxu0 %v934_v50  ;;  %v1732_v50 = vld [vmem:[%s2731_s12] ss:$0 sm:$0xff] }
 0x1fd   :  { %1451 = vmatprep.subr.bf16.mxu0 %v2061_v8  ;;  %v2129_v8 = vld [vmem:[%s2732_s13 + $0x12c] ss:$28 sps:$4 sm:$0xff]  }
 0x2ce   :  { %v844_v52 = vpop.f32.mrb[8].mxu0 }
 0x2cf   :  { %v845_v53 = vadd.f32 %v1720_v51, %v844_v52  ;;  %v1930_v54 = vpop.f32.mrb[9].mxu0 }
 0x2d0   :  { %v847_v55 = vpop.f32.mrb[10].mxu0 }
 0x2d1   :  { %v850_v56 = vmax.f32 %v845_v53, 0.0  ;;  %v1931_v57 = vpop.f32.mrb[11].mxu0 }
 0x2d2   :  { %v2107_v57 = vld [vmem:[%s2732_s13 + $0x10] ss:$28 sps:$4 sm:$0xff]  }
 0x2d3   :  { %v851_v58 = vpack.c.bf16 %v850_v56, %v850_v56 }
 0x2d5   :  { %1935 = vmatmul.mubr.msk.bf16.vlgmr.msra.gmra.mrb[12].mxu1 %vm866_vm4, %v851_v58  ;;  %v2110_v58 = vld [vmem:[%s2732_s13 + $0x18] ss:$28 sps:$4 sm:$0xff]  }
 0x2d6   :  { %1952 = vmatprep.mubr.msk.bf16.mxu1 %vm2164_vm0, %v2163_v43  ;;  %1945 = vmatpush3.bf16.msra.mxu1 %v2055_v59 }
 0x2d7   :  { %1946 = vmatprep.subr.bf16.mxu1 %v2163_v43 }
 0x2da   :  { %1947 = vmatpush3.bf16.msra.mxu1 %v2056_v60  ;;  %v2113_v60 = vld [vmem:[%s2732_s13 + $0x4c] ss:$28 sps:$4 sm:$0xff]  }
 0x2db   :  { %1948 = vmatprep.subr.bf16.mxu1 %v2163_v43 }
 0x2de   :  { %1949 = vmatpush3.bf16.msra.mxu1 %v2057_v5  ;;  %v2125_v5 = vld [vmem:[%s2732_s13 + $0xf4] ss:$28 sps:$4 sm:$0xff]  }
 0x2df   :  { %1950 = vmatprep.subr.bf16.mxu1 %v2163_v43 }
 0x2e2   :  { %1951 = vmatpush3.bf16.msra.mxu1 %v2058_v6  ;;  %v2123_v6 = vld [vmem:[%s2732_s13 + $0xf0] ss:$28 sps:$4 sm:$0xff]  }
 0x2e3   :  { %1492 = vmatprep.subr.bf16.mxu1 %v2064_v9  ;;  %v2127_v9 = vld [vmem:[%s2732_s13 + $0x128] ss:$28 sps:$4 sm:$0xff]  }
 0x3a8   :  { %v908_v62 = vpop.f32.mrb[12].mxu1 }
 0x3a9   :  { %v909_v63 = vadd.f32 %v1726_v61, %v908_v62  ;;  %v1936_v0 = vpop.f32.mrb[13].mxu1  ;;  %v2111_v61 = vld [vmem:[%s2732_s13 + $0x48] ss:$28 sps:$4 sm:$0xff]   ;;  %v2114_v62 = vld [vmem:[%s2732_s13 + $0x50] ss:$28 sps:$4 sm:$0xff]  }
 0x3aa   :  { %v911_v1 = vpop.f32.mrb[14].mxu1  ;;  %v2115_v0 = vld [vmem:[%s2732_s13 + $0x80] ss:$28 sps:$4 sm:$0xff]  }
 0x3ab   :  { %v914_v2 = vmax.f32 %v909_v63, 0.0  ;;  %v1937_v3 = vpop.f32.mrb[15].mxu1  ;;  %v2117_v63 = vld [vmem:[%s2732_s13 + $0x84] ss:$28 sps:$4 sm:$0xff]  }
 0x3ac   :  { %v2118_v1 = vld [vmem:[%s2732_s13 + $0x88] ss:$28 sps:$4 sm:$0xff]   ;;  %v2119_v3 = vld [vmem:[%s2732_s13 + $0xb8] ss:$28 sps:$4 sm:$0xff]  }
 0x3ad   :  { %v915_v4 = vpack.c.bf16 %v914_v2, %v914_v2  ;;  %v2121_v2 = vld [vmem:[%s2732_s13 + $0xbc] ss:$28 sps:$4 sm:$0xff]  }
 0x3af   :  { %1941 = vmatmul.mubr.msk.bf16.vlgmr.msra.gmra.mrb[12].mxu0 %vm866_vm4, %v915_v4  ;;  %v2122_v4 = vld [vmem:[%s2732_s13 + $0xc0] ss:$28 sps:$4 sm:$0xff]  }
 0x3b0   :  { %1452 = vmatpush1.bf16.msra.mxu0 %v2059_v7  ;;  %1483 = vmatprep.mubr.bf16.mxu0 %v2165_v49  ;;  %v2126_v7 = vld [vmem:[%s2732_s13 + $0xf8] ss:$28 sps:$4 sm:$0xff]  }
 0x3b1   :  { %1453 = vmatprep.subr.bf16.mxu0 %v2067_v10  ;;  %v2130_v10 = vld [vmem:[%s2732_s13 + $0x130] ss:$28 sps:$4 sm:$0xff]  }
 0x3b4   :  { %1454 = vmatpush1.bf16.msra.mxu0 %v2065_v11  ;;  %v2133_v11 = vld [vmem:[%s2732_s13 + $0x164] ss:$28 sps:$4 sm:$0xff]  }
 0x3b5   :  { %1455 = vmatprep.subr.bf16.mxu0 %v2073_v12  ;;  %v2131_v12 = vld [vmem:[%s2732_s13 + $0x160] ss:$28 sps:$4 sm:$0xff]  }
 0x3b8   :  { %1456 = vmatpush1.bf16.msra.mxu0 %v2071_v13  ;;  %v2134_v13 = vld [vmem:[%s2732_s13 + $0x168] ss:$28 sps:$4 sm:$0xff]  }
 0x3b9   :  { %1457 = vmatprep.subr.bf16.mxu0 %v2079_v14  ;;  %v2137_v14 = vld [vmem:[%s2732_s13 + $0x19c] ss:$28 sps:$4 sm:$0xff]  }
 0x3bc   :  { %1458 = vmatpush1.bf16.msra.mxu0 %v2077_v15  ;;  %v2135_v15 = vld [vmem:[%s2732_s13 + $0x198] ss:$28 sps:$4 sm:$0xff]  }
 0x3bd   :  { %1459 = vmatprep.subr.bf16.mxu0 %v2085_v16  ;;  %v2138_v16 = vld [vmem:[%s2732_s13 + $0x1a0] ss:$28 sps:$4 sm:$0xff]  }
 0x3c0   :  { %1460 = vmatpush1.bf16.msra.mxu0 %v2083_v17  ;;  %v1128_v17 = vlaneseq }
 0x3c1   :  { %1461 = vmatprep.subr.bf16.mxu0 %v2091_v18 }
 0x3c2   :  { %v1129_v18 = vshrl.u32 %v1128_v17, 7 }
 0x3c4   :  { %1462 = vmatpush1.bf16.msra.mxu0 %v2089_v19  ;;  %v1130_v19 = vsub.s32 0, %v1129_v18 }
 0x3c5   :  { %1463 = vmatprep.subr.bf16.mxu0 %v2097_v20  ;;  %v1138_v20 = vsub.s32 2, %v1129_v18 }
 0x3c8   :  { %1464 = vmatpush1.bf16.msra.mxu0 %v2095_v21  ;;  %v1126_v21 = vld [vmem:[%s2733_s14] sm:$0x7f] }
 0x3c9   :  { %1465 = vmatprep.subr.bf16.mxu0 %v2103_v44  ;;  %v1146_v44 = vsub.s32 4, %v1129_v18 }
 0x3cc   :  { %1466 = vmatpush1.bf16.msra.mxu0 %v2101_v46  ;;  %v1150_v46 = vsub.s32 5, %v1129_v18 }
 0x3cd   :  { %1533 = vmatprep.subr.bf16.mxu0 %v2109_v48 }
 0x482   :  { %v970_v23 = vpop.f32.mrb[12].mxu0 }
 0x483   :  { %v971_v24 = vadd.f32 %v1729_v22, %v970_v23  ;;  %v1942_v25 = vpop.f32.mrb[13].mxu0  ;;  %v1134_v22 = vsub.s32 1, %v1129_v18  ;;  %v1142_v23 = vsub.s32 3, %v1129_v18 }
 0x484   :  { %v973_v26 = vpop.f32.mrb[14].mxu0  ;;  %v1139_v25 = vrot.slane %v1126_v21, %v1138_v20 }
 0x485   :  { %v976_v27 = vmax.f32 %v971_v24, 0.0  ;;  %v1943_v28 = vpop.f32.mrb[15].mxu0  ;;  %v1131_v24 = vrot.slane %v1126_v21, %v1130_v19  ;;  %v1135_v26 = vrot.slane %v1126_v21, %v1134_v22 }
 0x487   :  { %v977_v30 = vpack.c.bf16 %v976_v27, %v976_v27  ;;  %v1143_v27 = vrot.slane %v1126_v21, %v1142_v23 }
 0x489   :  { %1953 = vmatmul.mubr.msk.bf16.vlgmr.msra.gmra.mrb[16].mxu1 %vm806_vm3, %v977_v30 }
 0x48a   :  { %1493 = vmatpush1.bf16.msra.mxu1 %v2062_v29  ;;  %1524 = vmatprep.mubr.bf16.mxu1 %v2165_v49 }
 0x48b   :  { %1494 = vmatprep.subr.bf16.mxu1 %v2070_v31 }
 0x48e   :  { %1495 = vmatpush1.bf16.msra.mxu1 %v2068_v32 }
 0x48f   :  { %1496 = vmatprep.subr.bf16.mxu1 %v2076_v33 }
 0x492   :  { %1497 = vmatpush1.bf16.msra.mxu1 %v2074_v34 }
 0x493   :  { %1498 = vmatprep.subr.bf16.mxu1 %v2082_v35 }
 0x496   :  { %1499 = vmatpush1.bf16.msra.mxu1 %v2080_v36 }
 0x497   :  { %1500 = vmatprep.subr.bf16.mxu1 %v2088_v37 }
 0x49a   :  { %1501 = vmatpush1.bf16.msra.mxu1 %v2086_v38 }
 0x49b   :  { %1502 = vmatprep.subr.bf16.mxu1 %v2094_v39 }
 0x49e   :  { %1503 = vmatpush1.bf16.msra.mxu1 %v2092_v40 }
 0x49f   :  { %1504 = vmatprep.subr.bf16.mxu1 %v2100_v41 }
 0x4a2   :  { %1505 = vmatpush1.bf16.msra.mxu1 %v2098_v42 }
 0x4a3   :  { %1506 = vmatprep.subr.bf16.mxu1 %v2106_v45  ;;  %v1154_v45 = vsub.s32 6, %v1129_v18 }
 0x4a5   :  { %v1155_v48 = vrot.slane %v1126_v21, %v1154_v45 }
 0x4a6   :  { %1507 = vmatpush1.bf16.msra.mxu1 %v2104_v47  ;;  %v1147_v47 = vrot.slane %v1126_v21, %v1146_v44 }
 0x4a7   :  { %1956 = vmatprep.subr.bf16.mxu1 %v2163_v43 }
 0x55c   :  { %v1054_v51 = vpop.f32.mrb[16].mxu1 }
 0x55d   :  { %v1055_v52 = vadd.f32 %v1732_v50, %v1054_v51  ;;  %v1954_v53 = vpop.f32.mrb[17].mxu1 }
 0x55e   :  { %v1057_v54 = vpop.f32.mrb[18].mxu1 }
 0x55f   :  { %v1060_v55 = vmax.f32 %v1055_v52, 0.0  ;;  %v1955_v56 = vpop.f32.mrb[19].mxu1 }
 0x561   :  { %v1061_v59 = vpack.c.bf16 %v1060_v55, %v1060_v55 }
 0x563   :  { %1484 = vmatmul.mubr.bf16.vlgmr.msra.gmra.mrb[16].mxu0 %v1061_v59  ;;  %1525 = vmatmul.mubr.bf16.vlgmr.msra.gmra.mrb[20].mxu1 %v1061_v59 }
 0x564   :  { %1534 = vmatpush1.bf16.msra.mxu0 %v2107_v57  ;;  %1957 = vmatpush3.bf16.msra.mxu1 %v2110_v58 }
 0x565   :  { %1535 = vmatprep.subr.bf16.mxu0 %v2113_v60  ;;  %1958 = vmatprep.subr.bf16.mxu1 %v2163_v43 }
 0x566   :  { %1565 = vmatprep.mubr.bf16.mxu0 %v2165_v49  ;;  %1972 = vmatprep.mubr.msk.bf16.mxu1 %vm2164_vm0, %v2163_v43  ;;  %v1151_v49 = vrot.slane %v1126_v21, %v1150_v46 }
 0x568   :  { %1536 = vmatpush1.bf16.msra.mxu0 %v2111_v61  ;;  %1959 = vmatpush3.bf16.msra.mxu1 %v2114_v62 }
 0x569   :  { %1537 = vmatprep.subr.bf16.mxu0 %v2117_v63  ;;  %1960 = vmatprep.subr.bf16.mxu1 %v2163_v43 }
 0x56c   :  { %1538 = vmatpush1.bf16.msra.mxu0 %v2115_v0  ;;  %1961 = vmatpush3.bf16.msra.mxu1 %v2118_v1 }
 0x56d   :  { %1539 = vmatprep.subr.bf16.mxu0 %v2121_v2  ;;  %1962 = vmatprep.subr.bf16.mxu1 %v2163_v43 }
 0x570   :  { %1540 = vmatpush1.bf16.msra.mxu0 %v2119_v3  ;;  %1963 = vmatpush3.bf16.msra.mxu1 %v2122_v4 }
 0x571   :  { %1541 = vmatprep.subr.bf16.mxu0 %v2125_v5  ;;  %1964 = vmatprep.subr.bf16.mxu1 %v2163_v43 }
 0x574   :  { %1542 = vmatpush1.bf16.msra.mxu0 %v2123_v6  ;;  %1965 = vmatpush3.bf16.msra.mxu1 %v2126_v7 }
 0x575   :  { %1543 = vmatprep.subr.bf16.mxu0 %v2129_v8  ;;  %1966 = vmatprep.subr.bf16.mxu1 %v2163_v43 }
 0x578   :  { %1544 = vmatpush1.bf16.msra.mxu0 %v2127_v9  ;;  %1967 = vmatpush3.bf16.msra.mxu1 %v2130_v10 }
 0x579   :  { %1545 = vmatprep.subr.bf16.mxu0 %v2133_v11  ;;  %1968 = vmatprep.subr.bf16.mxu1 %v2163_v43 }
 0x57c   :  { %1546 = vmatpush1.bf16.msra.mxu0 %v2131_v12  ;;  %1969 = vmatpush3.bf16.msra.mxu1 %v2134_v13 }
 0x57d   :  { %1547 = vmatprep.subr.bf16.mxu0 %v2137_v14  ;;  %1970 = vmatprep.subr.bf16.mxu1 %v2163_v43 }
 0x580   :  { %1548 = vmatpush1.bf16.msra.mxu0 %v2135_v15  ;;  %1971 = vmatpush3.bf16.msra.mxu1 %v2138_v16 }
 0x583   :  { %1566 = vmatmul.mubr.bf16.vlgmr.msra.gmra.mrb[20].mxu0 %v1061_v59  ;;  %1973 = vmatmul.mubr.bf16.vlgmr.msra.gmra.mrb[24].mxu1 %v1061_v59 }
 0x636   :  { %v1485_v28 = vpop.f32.mrb[16].mxu0  ;;  %v1526_v43 = vpop.f32.mrb[20].mxu1 }
 0x637   :  { %v1486_v29 = vadd.f32 %v1485_v28, %v1131_v24  ;;  %v1527_v30 = vadd.f32 %v1526_v43, %v1139_v25  ;;  %v1487_v31 = vpop.f32.mrb[17].mxu0  ;;  %v1528_v32 = vpop.f32.mrb[21].mxu1 }
 0x638   :  { %v1488_v33 = vadd.f32 %v1487_v31, %v1135_v26  ;;  %v1529_v34 = vadd.f32 %v1528_v32, %v1143_v27  ;;  %v1489_v35 = vpop.f32.mrb[18].mxu0  ;;  %v1530_v36 = vpop.f32.mrb[22].mxu1 }
 0x639   :  { %v1490_v37 = vpop.f32.mrb[19].mxu0  ;;  %v1531_v38 = vpop.f32.mrb[23].mxu1 }
 0x63a   :  { %v1621_v39 = vcombine.low %v1486_v29, %v1488_v33  ;;  %v1622_v40 = vcombine.high %v1486_v29, %v1488_v33  ;;  %v1623_v41 = vcombine.low %v1527_v30, %v1529_v34  ;;  %v1624_v42 = vcombine.high %v1527_v30, %v1529_v34 }
 0x63c   :  { %1635 = vst [vmem:[#allocation2] sm:$0xff] %v1621_v39  ;;  %1640 = vst [vmem:[#allocation2 + $0x1c] sm:$0xff] %v1622_v40 }
 0x63d   :  { %1636 = vst [vmem:[#allocation2 + $0x8] sm:$0xff] %v1623_v41  ;;  %1641 = vst [vmem:[#allocation2 + $0x24] sm:$0xff] %v1624_v42 }
 0x656   :  { %v1567_v50 = vpop.f32.mrb[20].mxu0  ;;  %v1608_v51 = vpop.f32.mrb[24].mxu1 }
 0x657   :  { %v1568_v52 = vadd.f32 %v1567_v50, %v1147_v47  ;;  %v1609_v53 = vadd.f32 %v1608_v51, %v1155_v48  ;;  %v1569_v54 = vpop.f32.mrb[21].mxu0  ;;  %v1974_v55 = vpop.f32.mrb[25].mxu1 }
 0x658   :  { %v1570_v56 = vadd.f32 %v1569_v54, %v1151_v49  ;;  %v1571_v57 = vpop.f32.mrb[22].mxu0  ;;  %v1611_v58 = vpop.f32.mrb[26].mxu1 }
 0x659   :  { %v1627_v59 = vcombine.high %v1609_v53, %v1609_v53  ;;  %1639 = vst.msk [vmem:[#allocation2 + $0x18] sm:$0xf] %vm1638_vm5, %v1609_v53  ;;  %v1572_v60 = vpop.f32.mrb[23].mxu0  ;;  %v1975_v61 = vpop.f32.mrb[27].mxu1 }
 0x65a   :  { %v1625_v62 = vcombine.low %v1568_v52, %v1570_v56  ;;  %v1626_v63 = vcombine.high %v1568_v52, %v1570_v56 }
 0x65b   :  { %1643 = vst.msk [vmem:[#allocation2 + $0x34] sm:$0xf] %vm1638_vm5, %v1627_v59 }
 0x65c   :  { %1637 = vst [vmem:[#allocation2 + $0x10] sm:$0xff] %v1625_v62  ;;  %1642 = vst [vmem:[#allocation2 + $0x2c] sm:$0xff] %v1626_v63 }
 0x65d   :  { %1648 = vsyncadd [#allocation3], 448  ;;  %s2166_s13 = smov [#allocation2]  }
 0x65e   :  { %s1649_s14 = sshll.u32 %s2166_s13, 4  ;;  %s1650_s14 = int_to_ptr.vmem [resolvable:$true] %s1649_s14 }
 0x65f   :  { %s2139_s16 = scalar_lea.vmem %s1650_s14, 448  ;;  %s2143_s17 = scalar_lea.vmem %s1650_s14, 896 }
 0x660   :  { %p2140_p0 = scmp.ne.s32.totalorder %s1650_s14, %s2139_s16  ;;  %p2144_p1 = scmp.lt.s32.totalorder %s1650_s14, %s1650_s14 }
 0x661   :  { %p2145_p2 = scmp.lt.s32.totalorder %s2143_s17, %s2139_s16 }
 0x663   :  { %p2146_p3 = por %p2145_p2, %p2144_p1 }
 0x665   :  { %p2147_p4 = pnand %p2146_p3, %p2140_p0 }
 0x667   :  { %2150 = shalt.err (!%p2147_p4)
}
 0x668   :  { %s2151_s5 = scalar_lea.hbm %s2734_s15, 448 }
 0x669   :  { %p2152_p5 = scmp.ne.s32.totalorder %s2734_s15, %s2151_s5  ;;  %p2155_p6 = scmp.lt.u32.totalorder %s2151_s5, %s2734_s15 }
 0x66b   :  { %p2157_p7 = pnand %p2155_p6, %p2152_p5 }
 0x66d   :  { %2160 = shalt.err (!%p2157_p7)
}
 0x66e   :  { %s2167_s20 = smov 448   ;;  %s2168_s21 = smov 28  }
 0x66f   :  { %1655 = dma.vmem_to_hbm [thread:$0]  %s1650_s14, 448, %s2734_s15, [#allocation3], %s2167_s20, %s2167_s20, %s2168_s21  }
 0x670   :  { %2161 = dma.done.wait [#allocation3], 896  }
 0x671   :  { %2162 = vsyncadd [#allocation3], 4294966400 }
 0x672   :  { %1659 = vsyncpa [#allocation3], 1 }

</bundles_post_ra>
